<compile_context>
chip_gen: v7x
topology: tpu7x:2x2x1
jax: 0.10.0
libtpu: 0.0.40
codegen_flags: <defaults>
</compile_context>

<pallas_src>
import numpy as np
import jax
import jax.numpy as jnp
from jax.experimental import pallas as pl
from jax.experimental.pallas import tpu as pltpu


def _copy_kernel(x_ref, o_ref):
    # Flatten is pure data movement: stream the tile through VMEM.
    o_ref[...] = x_ref[...]


def _choose_flat_view(total):
    """Pick a (rows, lanes) factorization of `total` with a lane-dense last dim."""
    if total % 128 == 0:
        m = total // 128
        # Largest divisor of m that is <= 32  ->  lanes in [128, 4096], all
        # multiples of 128 (unmasked, lane-dense stores).
        d = max(d for d in range(1, min(m, 32) + 1) if m % d == 0)
        lanes = 128 * d
    else:
        # No 128-multiple cover exists.  Use the largest divisor of total that
        # is <= 4096 as the lane dim; the block then spans the full lane dim
        # (legal under the (8,128) rule) and stays as dense as possible.
        lanes = max(d for d in range(1, min(total, 4096) + 1) if total % d == 0)
    return total // lanes, lanes


def flatten_pallas(x, *, target_block_bytes=4 << 20):
    """Equivalent of torch.flatten(x, 1) for an N-D input (N >= 2)."""
    n = x.shape[0]
    k = int(np.prod(x.shape[1:])) if x.ndim > 1 else 1
    total = n * k
    itemsize = jnp.dtype(x.dtype).itemsize
    # Packed sublane multiple: 8 (f32), 16 (bf16), 32 (int8).
    sub = max(8, 32 // itemsize)

    rows, lanes = _choose_flat_view(total)

    # ~target_block_bytes per buffer, rounded down to a sublane multiple.
    tgt_rows = max(sub, (target_block_bytes // max(1, lanes * itemsize)) // sub * sub)
    block_rows = min(rows, tgt_rows)

    # v7x megacore: make sure the grid has >= 2 steps when there is enough data,
    # so "parallel" can shard the copy across both TensorCores.
    total_bytes = total * itemsize
    if total_bytes >= (2 << 20) and rows >= 2 * sub and block_rows >= rows:
        half = (rows + 1) // 2
        block_rows = min(rows, max(sub, ((half + sub - 1) // sub) * sub))

    params = pltpu.CompilerParams(
        dimension_semantics=("parallel",),   # megacore sharding on v7x
        vmem_limit_bytes=32 << 20,           # safe on v5e/v6e/v7x (<=16 MiB live)
    )
    cost = pl.CostEstimate(
        flops=0, transcendentals=0, bytes_accessed=2 * total_bytes
    )

    x2 = jnp.reshape(x, (rows, lanes))       # metadata-only, row-major
    out = pl.pallas_call(
        _copy_kernel,
        out_shape=jax.ShapeDtypeStruct((rows, lanes), x.dtype),
        grid=(pl.cdiv(rows, block_rows),),   # masked tail block if uneven
        in_specs=[pl.BlockSpec((block_rows, lanes), lambda i: (i, 0))],
        out_specs=pl.BlockSpec((block_rows, lanes), lambda i: (i, 0)),
        compiler_params=params,
        cost_estimate=cost,
    )(x2)
    return jnp.reshape(out, (n, k))          # metadata-only, row-major


if __name__ == "__main__":
    key = jax.random.PRNGKey(0)
    # Small NCHW input consistent with the module's usage.
    x = jax.random.normal(key, (2, 4, 16, 16), dtype=jnp.float32)

    flatten_fn = jax.jit(flatten_pallas)
    y = jax.block_until_ready(flatten_fn(x))

    # Reference: plain JAX equivalent of torch.flatten(x, 1).
    y_ref = jnp.reshape(x, (x.shape[0], -1))

    assert y.shape == (2, 4 * 16 * 16), y.shape
    assert y.dtype == x.dtype
    np.testing.assert_allclose(np.asarray(y), np.asarray(y_ref), rtol=0, atol=0)

    print("KERNEL_OK")
</pallas_src>

<mosaic_0001>
module attributes {stable_mosaic.version = 11 : i64} {
  func.func @_copy_kernel(%arg0: i32, %arg1: memref<1x2048xf32, #tpu.memory_space<vmem>>, %arg2: memref<1x2048xf32, #tpu.memory_space<vmem>>) attributes {dimension_semantics = [#tpu.dimension_semantics<parallel>], iteration_bounds = array<i64: 1>, scalar_prefetch = 0 : i64, scratch_operands = 0 : i64, tpu.core_type = #tpu.core_type<tc>, window_params = [{transform_indices = @transform_0, window_bounds = array<i64: 1, 2048>}, {transform_indices = @transform_1, window_bounds = array<i64: 1, 2048>}]} {
    %c0 = arith.constant 0 : index
    %c0_0 = arith.constant 0 : index
    %0 = vector.load %arg1[%c0, %c0_0] : memref<1x2048xf32, #tpu.memory_space<vmem>>, vector<1x2048xf32>
    %c0_1 = arith.constant 0 : index
    %c0_2 = arith.constant 0 : index
    %1 = vector.load %arg2[%c0_1, %c0_2] : memref<1x2048xf32, #tpu.memory_space<vmem>>, vector<1x2048xf32>
    tpu.vector_store %arg2[%c0_1, %c0_2], %0 {strides = array<i32>} : memref<1x2048xf32, #tpu.memory_space<vmem>>, vector<1x2048xf32>,
    return
  }
  func.func @transform_0(%arg0: i32) -> (i32, i32) {
    %c0_i32 = arith.constant 0 : i32
    %c0_i32_0 = arith.constant 0 : i32
    return %arg0, %c0_i32 : i32, i32
  }
  func.func @transform_1(%arg0: i32) -> (i32, i32) {
    %c0_i32 = arith.constant 0 : i32
    %c0_i32_0 = arith.constant 0 : i32
    return %arg0, %c0_i32 : i32, i32
  }
}

</mosaic_0001>

<bundles_post_ra>
// kernel: flatten_pallas.1
= control target key start
LH: loop header
LB: loop body
LE: loop exit
PB: predicated region body
PF: predicated region fallthrough
CT: control target
= control target key end

     0   :  { %s38_s0 = inlined_call_operand.vmem [shape: f32[1,2048], index: 0, kind: input, shape index: {}]   ;;  %s39_s1 = inlined_call_operand.vmem [shape: f32[1,2048], index: 1, kind: output, shape index: {}]  }
   0x1   :  { %v8_v0 = vld [vmem:[%s38_s0] sm:$0xff]  ;;  %v9_v1 = vld [vmem:[%s38_s0 + $0x8] sm:$0xff] }
   0x2   :  { %10 = vst [vmem:[%s39_s1] sm:$0xff] %v8_v0  ;;  %11 = vst [vmem:[%s39_s1 + $0x8] sm:$0xff] %v9_v1 }

</bundles_post_ra>
